<compile_context>
chip_gen: v6e
topology: v6e:2x2x1
jax: 0.10.0
libtpu: 0.0.40
codegen_flags: <defaults>
</compile_context>

<pallas_src>
import math
from functools import partial

import jax
import jax.numpy as jnp
from jax import lax
from jax.experimental import pallas as pl
from jax.experimental.pallas import tpu as pltpu


def _round_up(a, b):
    return (a + b - 1) // b * b


def _patch_embed_kernel(x_ref, w_ref, bg_ref, pos_ref, o_ref, *, tm, nglo):
    """Fused patch projection + conv bias + LayerNorm(gamma) + additive rows (APE / cls).

    x_ref   : (1, tm, K)   im2col patch rows (cls / tail-pad rows are zeros)
    w_ref   : (K, D)       projection weight (conv kernel reshaped), VMEM resident
    bg_ref  : (2, D)       row 0 = conv bias, row 1 = LN gamma (LN beta folded into pos)
    pos_ref : (tm, D)      additive term: token rows -> 2-D APE + LN beta,
                           cls rows -> cls_token + cls_pos_embed, pad rows -> 0
    o_ref   : (1, tm, D)
    """
    t = pl.program_id(0)                      # token-block axis (outermost grid dim)
    x = x_ref[0]                              # native dtype into the MXU
    y = jnp.dot(x, w_ref[...], preferred_element_type=jnp.float32)
    y = y + bg_ref[0:1, :].astype(jnp.float32)

    # LayerNorm over embed_dim on the f32 accumulator (eps = 1e-5, torch default).
    mean = jnp.mean(y, axis=-1, keepdims=True)
    yc = y - mean
    var = jnp.mean(yc * yc, axis=-1, keepdims=True)
    y = yc * lax.rsqrt(var + 1e-5) * bg_ref[1:2, :].astype(jnp.float32)  # rsqrt -> EUP slot

    if nglo > 0:
        # cls rows bypass conv/LN entirely: zero the LN path for the first nglo global
        # rows; pos_ref already holds cls_token + cls_pos_embed for them.
        row = t * tm + lax.broadcasted_iota(jnp.int32, (tm, 1), 0)
        y = jnp.where(row < nglo, 0.0, y)

    o_ref[0] = (y + pos_ref[...].astype(jnp.float32)).astype(o_ref.dtype)


def patch_embed_pallas(x, conv_w, conv_b, ln_g, ln_b,
                       cls_token, cls_pos_embed, x_pos_embed, y_pos_embed,
                       *, patch_size, tm_max=512, vmem_limit_bytes=None):
    """PatchEmbed.forward((x, nx, ny)) -> (tokens, nx, ny).

    x             : (B, C, H, W)
    conv_w        : (D, C, ph, pw)   torch Conv2d weight layout
    conv_b        : (D,)
    ln_g, ln_b    : (D,)             LayerNorm weight / bias
    cls_token     : (1, nglo, D) or None
    cls_pos_embed : (1, nglo, D)
    x_pos_embed   : (1, nx, D // 2)
    y_pos_embed   : (1, ny, D // 2)
    """
    ph, pw = patch_size
    B, C, H, W = x.shape
    D = conv_w.shape[0]
    nx, ny = H // ph, W // pw
    T = nx * ny
    K = C * ph * pw
    nglo = 0 if cls_token is None else cls_token.shape[1]
    N = nglo + T                      # final token count (cls + patches)

    # Token tile: as big as possible (amortize ~0.35us/grid-step) while minimizing padding.
    n_blocks = -(-N // tm_max)
    tm = max(8, _round_up(-(-N // n_blocks), 8))
    N_pad = n_blocks * tm

    # im2col at the TRUE K (no lane padding of the dominant stream). nglo zero rows are
    # prepended so the kernel writes the final [cls | tokens] layout directly (no slice +
    # concat epilogue). allow_input_fusion below lets XLA fuse this layout op into the
    # pallas operand instead of materializing an extra HBM copy.
    patches = x.reshape(B, C, nx, ph, ny, pw).transpose(0, 2, 4, 1, 3, 5).reshape(B, T, K)
    patches = jnp.pad(patches, ((0, 0), (nglo, N_pad - N), (0, 0)))

    w2d = conv_w.reshape(D, K).T                     # (K, D)
    bg = jnp.stack([conv_b, ln_g], axis=0)           # (2, D): conv bias, LN gamma

    # 2-D absolute positional embedding: token (i, j) -> [x_pos[i], y_pos[j]]; LN beta is
    # folded into the token rows (cls rows bypass LN so they get no beta).
    # TODO(synk): interpolate_pos_encoding (bicubic resize of this tiny (1, N, D) parameter,
    # hit when the runtime token count differs from the constructed grid) is host-side
    # parameter preprocessing and is not lowered to Pallas.
    xpe = jnp.broadcast_to(x_pos_embed[0][:, None, :], (nx, ny, D // 2))
    ype = jnp.broadcast_to(y_pos_embed[0][None, :, :], (nx, ny, D // 2))
    pos_tok = jnp.concatenate([xpe, ype], axis=-1).reshape(T, D) + ln_b[None, :]
    if nglo >= 1:
        pos_cls = (cls_token + cls_pos_embed)[0].astype(pos_tok.dtype)   # (nglo, D)
        pos_full = jnp.concatenate([pos_cls, pos_tok], axis=0)
    else:
        pos_full = pos_tok
    pos_full = jnp.pad(pos_full, ((0, N_pad - N), (0, 0)))

    itemsize = jnp.dtype(x.dtype).itemsize
    if vmem_limit_bytes is None:
        # Double-buffered operand/output tiles + f32 temporaries, with slack; cap at the
        # 64 MiB physical VMEM of v7x so we never squeeze surrounding fusions.
        per_step = itemsize * (tm * K + 2 * tm * D + K * D + 2 * D)
        vmem_limit_bytes = int(min(max(4 * per_step + 6 * 4 * tm * D, 4 << 20), 64 << 20))

    cost = pl.CostEstimate(
        flops=2 * B * N_pad * K * D + 10 * B * N_pad * D,
        transcendentals=B * N_pad,
        bytes_accessed=itemsize * (B * N_pad * K + K * D + 2 * D
                                   + N_pad * D + B * N_pad * D),
    )

    kernel = partial(_patch_embed_kernel, tm=tm, nglo=nglo)

    out = pl.pallas_call(
        kernel,
        out_shape=jax.ShapeDtypeStruct((B, N_pad, D), x.dtype),
        grid_spec=pltpu.PrefetchScalarGridSpec(
            num_scalar_prefetch=0,
            # Token-block axis OUTERMOST, batch innermost: weight/pos block indices are
            # constant across the inner batch loop (fetched once per token block), and the
            # larger token axis is the one Mosaic shards across v7x's two TensorCores.
            grid=(N_pad // tm, B),
            in_specs=[
                pl.BlockSpec((1, tm, K), lambda t, b: (b, t, 0)),   # patch rows (true K)
                pl.BlockSpec((K, D), lambda t, b: (0, 0)),          # projection weight
                pl.BlockSpec((2, D), lambda t, b: (0, 0)),          # conv bias + LN gamma
                pl.BlockSpec((tm, D), lambda t, b: (t, 0)),         # additive rows (APE/cls)
            ],
            out_specs=pl.BlockSpec((1, tm, D), lambda t, b: (b, t, 0)),
        ),
        compiler_params=pltpu.CompilerParams(
            dimension_semantics=("parallel", "parallel"),
            vmem_limit_bytes=vmem_limit_bytes,
            allow_input_fusion=[True, False, False, False],
        ),
        cost_estimate=cost,
    )(patches, w2d, bg, pos_full)

    # Only tail row padding (if any) is trimmed; cls rows were written in-kernel.
    tokens = out if N_pad == N else out[:, :N, :]

    # pos_drop(p=0.0) is the identity.
    return tokens, nx, ny


def patch_embed_reference(x, conv_w, conv_b, ln_g, ln_b,
                          cls_token, cls_pos_embed, x_pos_embed, y_pos_embed,
                          *, patch_size, eps=1e-5):
    ph, pw = patch_size
    B, C, H, W = x.shape
    D = conv_w.shape[0]
    nx, ny = H // ph, W // pw
    T = nx * ny
    K = C * ph * pw
    patches = x.reshape(B, C, nx, ph, ny, pw).transpose(0, 2, 4, 1, 3, 5).reshape(B, T, K)
    y = jnp.einsum("btk,kd->btd", patches, conv_w.reshape(D, K).T,
                   precision=lax.Precision.HIGHEST) + conv_b
    mean = y.mean(-1, keepdims=True)
    var = ((y - mean) ** 2).mean(-1, keepdims=True)
    y = (y - mean) / jnp.sqrt(var + eps) * ln_g + ln_b
    xpe = jnp.broadcast_to(x_pos_embed[0][:, None, :], (nx, ny, D // 2))
    ype = jnp.broadcast_to(y_pos_embed[0][None, :, :], (nx, ny, D // 2))
    pos2d = jnp.concatenate([xpe, ype], axis=-1).reshape(T, D)
    y = y + pos2d[None]
    nglo = cls_token.shape[1]
    if nglo >= 1:
        cls = jnp.broadcast_to(cls_token + cls_pos_embed, (B, nglo, D))
        y = jnp.concatenate([cls, y], axis=1)
    return y, nx, ny


if __name__ == "__main__":
    key = jax.random.PRNGKey(0)
    kx, kw, kb, kg, kbt, kc, kcp, kxp, kyp = jax.random.split(key, 9)

    B, C, Himg, Wimg = 2, 3, 32, 32
    patch_size = (4, 4)
    embed_dim = 128            # multiple of 128 -> lane-dense output stores
    nglo = 1
    nx, ny = Himg // patch_size[0], Wimg // patch_size[1]

    x = jax.random.normal(kx, (B, C, Himg, Wimg), jnp.float32)
    fan_in = C * patch_size[0] * patch_size[1]
    bound = 1.0 / math.sqrt(fan_in)
    conv_w = jax.random.uniform(kw, (embed_dim, C, patch_size[0], patch_size[1]),
                                jnp.float32, -bound, bound)
    conv_b = jax.random.uniform(kb, (embed_dim,), jnp.float32, -bound, bound)
    ln_g = 1.0 + 0.1 * jax.random.normal(kg, (embed_dim,), jnp.float32)
    ln_b = 0.1 * jax.random.normal(kbt, (embed_dim,), jnp.float32)
    cls_token = 0.02 * jax.random.normal(kc, (1, nglo, embed_dim), jnp.float32)
    cls_pos_embed = 0.02 * jax.random.normal(kcp, (1, nglo, embed_dim), jnp.float32)
    x_pos_embed = 0.02 * jax.random.normal(kxp, (1, nx, embed_dim // 2), jnp.float32)
    y_pos_embed = 0.02 * jax.random.normal(kyp, (1, ny, embed_dim // 2), jnp.float32)

    pe = jax.jit(patch_embed_pallas,
                 static_argnames=("patch_size", "tm_max", "vmem_limit_bytes"))
    out, onx, ony = pe(x, conv_w, conv_b, ln_g, ln_b,
                       cls_token, cls_pos_embed, x_pos_embed, y_pos_embed,
                       patch_size=patch_size)
    out = jax.block_until_ready(out)

    ref, rnx, rny = patch_embed_reference(x, conv_w, conv_b, ln_g, ln_b,
                                          cls_token, cls_pos_embed,
                                          x_pos_embed, y_pos_embed,
                                          patch_size=patch_size)

    assert out.shape == (B, nglo + nx * ny, embed_dim), out.shape
    assert (int(onx), int(ony)) == (nx, ny)
    # Tolerance covers MXU matmul precision modes vs the HIGHEST-precision f32 reference;
    # real indexing/layout bugs show up as O(1) errors.
    assert jnp.allclose(out, ref, atol=2e-2, rtol=2e-2), float(jnp.max(jnp.abs(out - ref)))

    print("KERNEL_OK")
</pallas_src>

<mosaic_0001>
module attributes {stable_mosaic.version = 11 : i64} {
  func.func @_patch_embed_kernel(%arg0: i32, %arg1: i32, %arg2: memref<1x72x48xf32, #tpu.memory_space<vmem>>, %arg3: memref<48x128xf32, #tpu.memory_space<vmem>>, %arg4: memref<2x128xf32, #tpu.memory_space<vmem>>, %arg5: memref<72x128xf32, #tpu.memory_space<vmem>>, %arg6: memref<1x72x128xf32, #tpu.memory_space<vmem>>) attributes {dimension_semantics = [#tpu.dimension_semantics<parallel>, #tpu.dimension_semantics<parallel>], iteration_bounds = array<i64: 1, 2>, scalar_prefetch = 0 : i64, scratch_operands = 0 : i64, tpu.core_type = #tpu.core_type<tc>, window_params = [{transform_indices = @transform_0, window_bounds = array<i64: 1, 72, 48>}, {pipeline_mode = #tpu.pipeline_mode<synchronous>, transform_indices = @transform_1, window_bounds = array<i64: 48, 128>}, {pipeline_mode = #tpu.pipeline_mode<synchronous>, transform_indices = @transform_2, window_bounds = array<i64: 2, 128>}, {transform_indices = @transform_3, window_bounds = array<i64: 72, 128>}, {transform_indices = @transform_4, window_bounds = array<i64: 1, 72, 128>}]} {
    %c0 = arith.constant 0 : index
    %c0_0 = arith.constant 0 : index
    %c0_1 = arith.constant 0 : index
    %0 = vector.load %arg2[%c0, %c0_0, %c0_1] : memref<1x72x48xf32, #tpu.memory_space<vmem>>, vector<1x72x48xf32>
    %1 = vector.shape_cast %0 : vector<1x72x48xf32> to vector<72x48xf32>
    %c0_2 = arith.constant 0 : index
    %c0_3 = arith.constant 0 : index
    %2 = vector.load %arg3[%c0_2, %c0_3] : memref<48x128xf32, #tpu.memory_space<vmem>>, vector<48x128xf32>
    %cst = arith.constant dense<0.000000e+00> : vector<72x128xf32>
    %3 = tpu.matmul %1, %2, %cst {dimension_numbers = #tpu.dot_dimension_numbers<[1], [0], [0], [1], [0, 0, 1, 1], [], []>} : vector<72x48xf32>, vector<48x128xf32>, vector<72x128xf32> -> vector<72x128xf32>
    %c0_4 = arith.constant 0 : index
    %c0_5 = arith.constant 0 : index
    %4 = vector.load %arg4[%c0_4, %c0_5] : memref<2x128xf32, #tpu.memory_space<vmem>>, vector<1x128xf32>
    %5 = vector.broadcast %4 : vector<1x128xf32> to vector<72x128xf32>
    %6 = arith.addf %3, %5 : vector<72x128xf32>
    %cst_6 = arith.constant dense<0.000000e+00> : vector<72xf32>
    %7 = vector.multi_reduction <add>, %6, %cst_6 [1] : vector<72x128xf32> to vector<72xf32>
    %8 = vector.shape_cast %7 : vector<72xf32> to vector<72x1xf32>
    %cst_7 = arith.constant 1.280000e+02 : f32
    %9 = vector.broadcast %cst_7 : f32 to vector<72x1xf32>
    %10 = arith.divf %8, %9 : vector<72x1xf32>
    %11 = vector.broadcast %10 : vector<72x1xf32> to vector<72x128xf32>
    %12 = arith.subf %6, %11 : vector<72x128xf32>
    %13 = arith.mulf %12, %12 : vector<72x128xf32>
    %cst_8 = arith.constant dense<0.000000e+00> : vector<72xf32>
    %14 = vector.multi_reduction <add>, %13, %cst_8 [1] : vector<72x128xf32> to vector<72xf32>
    %15 = vector.shape_cast %14 : vector<72xf32> to vector<72x1xf32>
    %cst_9 = arith.constant 1.280000e+02 : f32
    %16 = vector.broadcast %cst_9 : f32 to vector<72x1xf32>
    %17 = arith.divf %15, %16 : vector<72x1xf32>
    %cst_10 = arith.constant 9.99999974E-6 : f32
    %18 = vector.broadcast %cst_10 : f32 to vector<72x1xf32>
    %19 = arith.addf %17, %18 : vector<72x1xf32>
    %20 = math.rsqrt %19 : vector<72x1xf32>
    %21 = vector.broadcast %20 : vector<72x1xf32> to vector<72x128xf32>
    %22 = arith.mulf %12, %21 : vector<72x128xf32>
    %c1 = arith.constant 1 : index
    %c0_11 = arith.constant 0 : index
    %23 = vector.load %arg4[%c1, %c0_11] : memref<2x128xf32, #tpu.memory_space<vmem>>, vector<1x128xf32>
    %24 = vector.broadcast %23 : vector<1x128xf32> to vector<72x128xf32>
    %25 = arith.mulf %22, %24 : vector<72x128xf32>
    %c72_i32 = arith.constant 72 : i32
    %26 = arith.muli %arg0, %c72_i32 : i32
    %27 = tpu.iota {dimensions = array<i32: 0>} : vector<72x1xi32>
    %28 = vector.broadcast %26 : i32 to vector<72x1xi32>
    %29 = arith.addi %28, %27 : vector<72x1xi32>
    %c1_i32 = arith.constant 1 : i32
    %30 = vector.broadcast %c1_i32 : i32 to vector<72x1xi32>
    %31 = arith.cmpi slt, %29, %30 : vector<72x1xi32>
    %cst_12 = arith.constant 0.000000e+00 : f32
    %32 = vector.shape_cast %31 : vector<72x1xi1> to vector<72x1xi1>
    %33 = vector.broadcast %32 : vector<72x1xi1> to vector<72x128xi1>
    %34 = vector.broadcast %cst_12 : f32 to vector<72x128xf32>
    %35 = arith.select %33, %34, %25 : vector<72x128xi1>, vector<72x128xf32>
    %c0_13 = arith.constant 0 : index
    %c0_14 = arith.constant 0 : index
    %36 = vector.load %arg5[%c0_13, %c0_14] : memref<72x128xf32, #tpu.memory_space<vmem>>, vector<72x128xf32>
    %37 = arith.addf %35, %36 : vector<72x128xf32>
    %c0_15 = arith.constant 0 : index
    %c0_16 = arith.constant 0 : index
    %c0_17 = arith.constant 0 : index
    %38 = vector.load %arg6[%c0_15, %c0_16, %c0_17] : memref<1x72x128xf32, #tpu.memory_space<vmem>>, vector<1x72x128xf32>
    %39 = vector.shape_cast %38 : vector<1x72x128xf32> to vector<72x128xf32>
    %40 = vector.shape_cast %37 : vector<72x128xf32> to vector<1x72x128xf32>
    tpu.vector_store %arg6[%c0_15, %c0_16, %c0_17], %40 {strides = array<i32>} : memref<1x72x128xf32, #tpu.memory_space<vmem>>, vector<1x72x128xf32>,
    return
  }
  func.func @transform_0(%arg0: i32, %arg1: i32) -> (i32, i32, i32) {
    %c0_i32 = arith.constant 0 : i32
    %c0_i32_0 = arith.constant 0 : i32
    return %arg1, %arg0, %c0_i32 : i32, i32, i32
  }
  func.func @transform_1(%arg0: i32, %arg1: i32) -> (i32, i32) {
    %c0_i32 = arith.constant 0 : i32
    %c0_i32_0 = arith.constant 0 : i32
    %c0_i32_1 = arith.constant 0 : i32
    return %c0_i32, %c0_i32_0 : i32, i32
  }
  func.func @transform_2(%arg0: i32, %arg1: i32) -> (i32, i32) {
    %c0_i32 = arith.constant 0 : i32
    %c0_i32_0 = arith.constant 0 : i32
    %c0_i32_1 = arith.constant 0 : i32
    return %c0_i32, %c0_i32_0 : i32, i32
  }
  func.func @transform_3(%arg0: i32, %arg1: i32) -> (i32, i32) {
    %c0_i32 = arith.constant 0 : i32
    %c0_i32_0 = arith.constant 0 : i32
    return %arg0, %c0_i32 : i32, i32
  }
  func.func @transform_4(%arg0: i32, %arg1: i32) -> (i32, i32, i32) {
    %c0_i32 = arith.constant 0 : i32
    %c0_i32_0 = arith.constant 0 : i32
    return %arg1, %arg0, %c0_i32 : i32, i32, i32
  }
}

</mosaic_0001>

<bundles_post_ra>
// kernel: patch_embed_pallas.2
= control target key start
LH: loop header
LB: loop body
LE: loop exit
PB: predicated region body
PF: predicated region fallthrough
CT: control target
= control target key end

     0   :  { %s1115_s20 = smov 0   ;;  %s1117_s21 = smov 0   ;;  %s1359_s0 = inlined_call_operand.vmem [shape: f32[48,128], index: 0, kind: input, shape index: {}]   ;;  %s1360_s1 = inlined_call_operand.vmem [shape: f32[2,128], index: 1, kind: input, shape index: {}]   ;;  %s1361_s2 = inlined_call_operand.vmem [shape: f32[72,128], index: 2, kind: input, shape index: {}]   ;;  %s1362_s3 = inlined_call_operand.vmem [shape: f32[2,64,48], index: 3, kind: input, shape index: {}]   ;;  %s1363_s4 = inlined_call_operand.<no memory space> [shape: f32[], index: 4, kind: input, shape index: {}]   ;;  %s1364_s5 = inlined_call_operand.vmem [shape: f32[2,72,128], index: 5, kind: output, shape index: {}]  }
   0x1   :  { %v1113_v0 = vstv %s1363_s4  ;;  %s1119_s22 = smov 0  }
   0x2 LB: > { %s25_s4 = sadd.s32 1, %s1072_s21  ;;  %p918_p0 = scmp.ge.s32.totalorder %s1076_s22, 1  ;;  %s1076_s22 = sphi %s1119_s22, %s16_s22   ;;  %s1072_s21 = sphi %s1117_s21, %s1366_s21   ;;  %s1068_s20 = sphi %s1115_s20, %s1365_s20  }
   0x3   : > { %p26_p1 = scmp.ge.s32.totalorder %s25_s4, 2  ;;  %p209_p2 = scmp.lt.s32.totalorder %s1076_s22, 3 }
   0x5   : > { %s1368_s4 = smov (%p26_p1, %s25_s4), 0  ;;  %p210_p3 = pnand %p918_p0, %p209_p2 }
   0x6   : > { %p262_p4 = scmp.lt.s32.totalorder (!%p210_p3), %s1068_s20, 1 }
   0x7   : > { %213 = sbr.rel (%p210_p3) target bundleno = 548 (0x224), region = 36 }
   0xc   : > { %v469_v1 = vld [vmem:[%s1359_s0 + $0x28] sm:$0xff]  ;;  %v313_v2 = vlaneseq  ;;  %v1078_v3 = vmov 0.0   ;;  %v468_v4 = vld [vmem:[%s1359_s0 + $0x20] sm:$0xff]  ;;  %s1370_s20 = smov (!%p262_p4, %s1068_s20), 1  ;;  %v467_v6 = vld [vmem:[%s1359_s0 + $0x18] sm:$0xff]  ;;  %vm318_vm1 = vcmask 1046528  }
   0xd   : > { %958 = vmatprep.subr.mxu0 %v1078_v3  ;;  %997 = vmatprep.subr.mxu1 %v1078_v3  ;;  %s919_s29 = sshll.u32 %s1370_s20, 3  ;;  %v466_v7 = vld [vmem:[%s1359_s0 + $0x10] sm:$0xff]  ;;  %v465_v8 = vld [vmem:[%s1359_s0 + $0x8] sm:$0xff]  ;;  %v464_v9 = vld [vmem:[%s1359_s0] sm:$0xff]  ;;  %vm475_vm2 = vcmask 392192   ;;  %vm1079_vm3 = vmmov 0  }
   0xe   : > { %959 = vmatpush3.msra.mxu0 %v469_v1  ;;  %1003 = vmatpush3.msra.mxu1 %v469_v1  ;;  %v1144_v5 = vand.u32 127, %v313_v2  ;;  %s268_s7 = sadd.s32 4294967295, %s919_s29  ;;  %v930_v44 = vld [vmem:[%s1360_s1] ss:$0 sm:$0xff]  ;;  %s1009_s23 = smul.u32 72, %s1370_s20 }
   0xf   : > { %960 = vmatprep.subr.mxu0 %v1078_v3  ;;  %998 = vmatprep.subr.mxu1 %v1078_v3  ;;  %s920_s8 = sshll.u32 %s268_s7, 3 }
  0x10   : > { %961 = vmatpush3.msra.mxu0 %v468_v4  ;;  %1004 = vmatpush3.msra.mxu1 %v468_v4  ;;  %vm316_vm0 = vcmp.lt.s32.totalorder %v1144_v5, 48  ;;  %s1169_s15 = scalar_lea.vmem %s1362_s3, %s920_s8  ;;  %s1304_s29 = scalar_lea.vmem %s1364_s5, %s1009_s23 }
  0x11   : > { %962 = vmatprep.subr.mxu0 %v1078_v3  ;;  %999 = vmatprep.subr.mxu1 %v1078_v3  ;;  %v922_v10 = vld [vmem:[%s1169_s15 + $0x8] sm:$0xff]  ;;  %v927_v12 = vld [vmem:[%s1169_s15 + $0x30] sm:$0xff]  ;;  %v928_v17 = vld [vmem:[%s1169_s15 + $0x38] sm:$0xff] }
  0x12   : > { %963 = vmatpush3.msra.mxu0 %v467_v6  ;;  %1005 = vmatpush3.msra.mxu1 %v467_v6  ;;  %v926_v11 = vld [vmem:[%s1169_s15 + $0x28] sm:$0xff]  ;;  %v317_v13 = vsel %vm316_vm0, %v922_v10, %v1113_v0  ;;  %v386_v15 = vsel %vm316_vm0, %v927_v12, %v1113_v0  ;;  %v923_v16 = vld [vmem:[%s1169_s15 + $0x10] sm:$0xff]  ;;  %v924_v18 = vld [vmem:[%s1169_s15 + $0x18] sm:$0xff]  ;;  %v413_v26 = vsel %vm316_vm0, %v928_v17, %v1113_v0 }
  0x13   : > { %964 = vmatprep.subr.mxu0 %v1078_v3  ;;  %1000 = vmatprep.subr.mxu1 %v1078_v3  ;;  %v372_v14 = vsel %vm316_vm0, %v926_v11, %v1113_v0  ;;  %v319_v19 = vsel %vm318_vm1, %v317_v13, %v1113_v0  ;;  %v330_v21 = vsel %vm316_vm0, %v923_v16, %v1113_v0  ;;  %v929_v22 = vld [vmem:[%s1169_s15 + $0x40] sm:$0xff] }
  0x14   : > { %965 = vmatpush3.msra.mxu0 %v466_v7  ;;  %1006 = vmatpush3.msra.mxu1 %v466_v7  ;;  %v388_v20 = vsel %vm318_vm1, %v386_v15, %v372_v14  ;;  %v320_v23 = vrot.slane %v319_v19, 7  ;;  %v332_v25 = vsel %vm318_vm1, %v330_v21, %v317_v13  ;;  %v415_v27 = vsel %vm318_vm1, %v413_v26, %v386_v15  ;;  %v925_v29 = vld [vmem:[%s1169_s15 + $0x20] sm:$0xff] }
  0x15   : > { %966 = vmatprep.subr.mxu0 %v1078_v3  ;;  %1001 = vmatprep.subr.mxu1 %v1078_v3  ;;  %v389_v24 = vrot.slane %v388_v20, 7  ;;  %v344_v28 = vsel %vm316_vm0, %v924_v18, %v1113_v0  ;;  %v440_v30 = vsel %vm316_vm0, %v929_v22, %v1113_v0  ;;  %v333_v31 = vrot.slane %v332_v25, 7 }
  0x16   : > { %967 = vmatpush3.msra.mxu0 %v465_v8  ;;  %1007 = vmatpush3.msra.mxu1 %v465_v8  ;;  %v416_v32 = vrot.slane %v415_v27, 7  ;;  %v346_v33 = vsel %vm318_vm1, %v344_v28, %v330_v21  ;;  %v442_v34 = vsel %vm318_vm1, %v440_v30, %v413_v26  ;;  %v358_v35 = vsel %vm316_vm0, %v925_v29, %v1113_v0 }
  0x17   : > { %968 = vmatprep.subr.mxu0 %v1078_v3  ;;  %1002 = vmatprep.subr.mxu1 %v1078_v3  ;;  %v347_v36 = vrot.slane %v346_v33, 7  ;;  %v443_v37 = vrot.slane %v442_v34, 7  ;;  %v360_v38 = vsel %vm318_vm1, %v358_v35, %v344_v28  ;;  %v449_v39 = vsel %vm318_vm1, %v1113_v0, %v440_v30 }
  0x18   : > { %969 = vmatpush3.msra.mxu0 %v464_v9  ;;  %1008 = vmatpush3.msra.mxu1 %v464_v9  ;;  %v361_v40 = vrot.slane %v360_v38, 7  ;;  %v450_v41 = vrot.slane %v449_v39, 7  ;;  %v374_v42 = vsel %vm318_vm1, %v372_v14, %v358_v35 }
  0x19   : > { %970 = vmatprep.mubr.msk.f32.mxu0 %vm1079_vm3, %v1078_v3  ;;  %985 = vmatprep.mubr.msk.f32.mxu1 %vm1079_vm3, %v1078_v3  ;;  %v375_v43 = vrot.slane %v374_v42, 7 }
  0x1a   : > { %971 = vmatmul.mubr.msk.f32.vlgmr.msra.gmra.mxu0 %vm475_vm2, %v320_v23  ;;  %986 = vmatmul.mubr.msk.f32.vlgmr.msra.gmra.mxu1 %vm475_vm2, %v389_v24 }
  0x1b   : > { %973 = vmatprep.mubr.msk.f32.mxu0 %vm1079_vm3, %v1078_v3  ;;  %988 = vmatprep.mubr.msk.f32.mxu1 %vm1079_vm3, %v1078_v3 }
  0x1e   : > { %974 = vmatmul.mubr.msk.f32.gmra.mxu0 %vm475_vm2, %v333_v31  ;;  %989 = vmatmul.mubr.msk.f32.gmra.mxu1 %vm475_vm2, %v416_v32 }
  0x1f   : > { %976 = vmatprep.mubr.msk.f32.mxu0 %vm1079_vm3, %v1078_v3  ;;  %991 = vmatprep.mubr.msk.f32.mxu1 %vm1079_vm3, %v1078_v3 }
  0x22   : > { %977 = vmatmul.mubr.msk.f32.gmra.mxu0 %vm475_vm2, %v347_v36  ;;  %992 = vmatmul.mubr.msk.f32.gmra.mxu1 %vm475_vm2, %v443_v37 }
  0x23   : > { %979 = vmatprep.mubr.msk.f32.mxu0 %vm1079_vm3, %v1078_v3  ;;  %994 = vmatprep.mubr.msk.f32.mxu1 %vm1079_vm3, %v1078_v3 }
  0x26   : > { %980 = vmatmul.mubr.msk.f32.gmra.mxu0 %vm475_vm2, %v361_v40  ;;  %995 = vmatmul.mubr.msk.f32.gmra.mxu1 %vm475_vm2, %v450_v41 }
  0x27   : > { %982 = vmatprep.mubr.msk.f32.mxu0 %vm1079_vm3, %v1078_v3 }
  0x2a   : > { %983 = vmatmul.mubr.msk.f32.gmra.mxu0 %vm475_vm2, %v375_v43 }
  0xda   : > { %v569_v45 = vpop.f32.mrf.mxu0  ;;  %v594_v46 = vpop.f32.mrf.mxu1 }
  0xdb   : > { %v570_v47 = vadd.f32 %v930_v44, %v569_v45  ;;  %v595_v48 = vadd.f32 %v930_v44, %v594_v46 }
  0xdc   : > { %v972_v49 = vpop.f32.mrf.mxu0  ;;  %v987_v50 = vpop.f32.mrf.mxu1 }
  0xdd   : > { %623 = vadd.xlane.f32.xlu1 %v595_v48  ;;  %613 = vadd.xlane.f32.xlu0 %v570_v47 }
  0xde   : > { %v574_v51 = vpop.f32.mrf.mxu0  ;;  %v599_v52 = vpop.f32.mrf.mxu1 }
  0xdf   : > { %v575_v53 = vadd.f32 %v930_v44, %v574_v51  ;;  %v600_v56 = vadd.f32 %v930_v44, %v599_v52 }
  0xe0   : > { %v975_v54 = vpop.f32.mrf.mxu0  ;;  %v990_v55 = vpop.f32.mrf.mxu1 }
  0xe1   : > { %615 = vadd.xlane.f32.xlu0 %v575_v53 }
  0xe2   : > { %v579_v57 = vpop.f32.mrf.mxu0  ;;  %v604_v58 = vpop.f32.mrf.mxu1 }
  0xe3   : > { %v580_v59 = vadd.f32 %v930_v44, %v579_v57  ;;  %v605_v5 = vadd.f32 %v930_v44, %v604_v58 }
  0xe4   : > { %v978_v60 = vpop.f32.mrf.mxu0  ;;  %v993_v61 = vpop.f32.mrf.mxu1 }
  0xe5   : > { %625 = vadd.xlane.f32.xlu0 %v600_v56  ;;  %617 = vadd.xlane.f32.xlu1 %v580_v59 }
  0xe6   : > { %v584_v62 = vpop.f32.mrf.mxu0  ;;  %v609_v63 = vpop.f32.mrf.mxu1 }
  0xe7   : > { %v585_v1 = vadd.f32 %v930_v44, %v584_v62  ;;  %v610_v9 = vadd.f32 %v930_v44, %v609_v63 }
  0xe8   : > { %v981_v3 = vpop.f32.mrf.mxu0  ;;  %v996_v4 = vpop.f32.mrf.mxu1 }
  0xe9   : > { %619 = vadd.xlane.f32.xlu1 %v585_v1 }
  0xea   : > { %v589_v6 = vpop.f32.mrf.mxu0 }
  0xeb   : > { %v590_v7 = vadd.f32 %v930_v44, %v589_v6 }
  0xec   : > { %v984_v8 = vpop.f32.mrf.mxu0 }
  0xed   : > { %627 = vadd.xlane.f32.xlu1 %v605_v5  ;;  %621 = vadd.xlane.f32.xlu0 %v590_v7  ;;  %v1288_v8 = vld [vmem:[%s1360_s1 + $0x1] ss:$0 sm:$0xff] }
  0xf1   : > { %629 = vadd.xlane.f32.xlu0 %v610_v9 }
 0x166   : > { %v624_v10 = vpop.xlane.xlu1 %623  ;;  %v614_v11 = vpop.xlane.xlu0 %613 }
 0x167   : > { %v637_v12 = vmul.f32 0.0078125, %v624_v10  ;;  %v632_v13 = vmul.f32 0.0078125, %v614_v11 }
 0x169   : > { %v1248_v14 = vsub.f32 %v595_v48, %v637_v12  ;;  %v1250_v15 = vsub.f32 %v570_v47, %v632_v13 }
 0x16a   : > { %v616_v16 = vpop.xlane.xlu0 %615 }
 0x16b   : > { %v633_v17 = vmul.f32 0.0078125, %v616_v16  ;;  %v650_v18 = vmul.f32 %v1250_v15, %v1250_v15  ;;  %v655_v19 = vmul.f32 %v1248_v14, %v1248_v14  ;;  %v784_v16 = vld [vmem:[%s1361_s2] sm:$0xff] }
 0x16d   : > { %v1256_v20 = vsub.f32 %v575_v53, %v633_v17  ;;  %659 = vadd.xlane.f32.xlu1 %v650_v18  ;;  %669 = vadd.xlane.f32.xlu0 %v655_v19  ;;  %v789_v18 = vld [vmem:[%s1361_s2 + $0x28] sm:$0xff] }
 0x16e   : > { %v626_v21 = vpop.xlane.xlu0 %625  ;;  %v618_v22 = vpop.xlane.xlu1 %617 }
 0x16f   : > { %v638_v23 = vmul.f32 0.0078125, %v626_v21  ;;  %v634_v24 = vmul.f32 0.0078125, %v618_v22  ;;  %v651_v25 = vmul.f32 %v1256_v20, %v1256_v20 }
 0x171   : > { %v1260_v26 = vsub.f32 %v600_v56, %v638_v23  ;;  %661 = vadd.xlane.f32.xlu0 %v651_v25  ;;  %v1262_v28 = vsub.f32 %v580_v59, %v634_v24 }
 0x172   : > { %v620_v27 = vpop.xlane.xlu1 %619 }
 0x173   : > { %v635_v29 = vmul.f32 0.0078125, %v620_v27  ;;  %v656_v30 = vmul.f32 %v1260_v26, %v1260_v26  ;;  %v652_v36 = vmul.f32 %v1262_v28, %v1262_v28  ;;  %v785_v27 = vld [vmem:[%s1361_s2 + $0x8] sm:$0xff] }
 0x175   : > { %v1266_v31 = vsub.f32 %v585_v1, %v635_v29  ;;  %671 = vadd.xlane.f32.xlu1 %v656_v30  ;;  %v729_v1 = vshrl.u32 %v313_v2, 7 }
 0x176   : > { %v628_v32 = vpop.xlane.xlu1 %627  ;;  %v622_v33 = vpop.xlane.xlu0 %621 }
 0x177   : > { %v639_v34 = vmul.f32 0.0078125, %v628_v32  ;;  %v636_v35 = vmul.f32 0.0078125, %v622_v33  ;;  %v653_v37 = vmul.f32 %v1266_v31, %v1266_v31  ;;  %vm748_vm4 = vcmp.lt.s32.totalorder %v729_v1, 1 }
 0x179   : > { %v1272_v38 = vsub.f32 %v605_v5, %v639_v34  ;;  %v1274_v39 = vsub.f32 %v590_v7, %v636_v35  ;;  %663 = vadd.xlane.f32.xlu1 %v652_v36  ;;  %665 = vadd.xlane.f32.xlu0 %v653_v37 }
 0x17a   : > { %v630_v40 = vpop.xlane.xlu0 %629 }
 0x17b   : > { %v640_v41 = vmul.f32 0.0078125, %v630_v40  ;;  %v657_v42 = vmul.f32 %v1272_v38, %v1272_v38  ;;  %v654_v43 = vmul.f32 %v1274_v39, %v1274_v39 }
 0x17d   : > { %v1280_v44 = vsub.f32 %v610_v9, %v640_v41  ;;  %673 = vadd.xlane.f32.xlu0 %v657_v42  ;;  %667 = vadd.xlane.f32.xlu1 %v654_v43  ;;  %v786_v41 = vld [vmem:[%s1361_s2 + $0x10] sm:$0xff]  ;;  %v787_v43 = vld [vmem:[%s1361_s2 + $0x18] sm:$0xff] }
 0x17f   : > { %v658_v45 = vmul.f32 %v1280_v44, %v1280_v44 }
 0x181   : > { %675 = vadd.xlane.f32.xlu1 %v658_v45 }
 0x1f6   : > { %v660_v46 = vpop.xlane.xlu1 %659  ;;  %v670_v47 = vpop.xlane.xlu0 %669 }
 0x1f7   : > { %v677_v48 = vmul.f32 0.0078125, %v660_v46  ;;  %v682_v49 = vmul.f32 0.0078125, %v670_v47 }
 0x1f9   : > { %v686_v50 = vadd.f32 1e-05, %v677_v48  ;;  %v691_v51 = vadd.f32 1e-05, %v682_v49 }
 0x1fa   : > { %v662_v52 = vpop.xlane.xlu0 %661 }
 0x1fb   : > { %1036 = vrsqrt.f32 %v686_v50  ;;  %v678_v53 = vmul.f32 0.0078125, %v662_v52  ;;  %v791_v52 = vld [vmem:[%s1361_s2 + $0x38] sm:$0xff] }
 0x1fc   : > { %1038 = vrsqrt.f32 %v691_v51 }
 0x1fd   : > { %v687_v54 = vadd.f32 1e-05, %v678_v53 }
 0x1fe   : > { %v672_v55 = vpop.xlane.xlu1 %671 }
 0x1ff   : > { %1040 = vrsqrt.f32 %v687_v54  ;;  %v683_v56 = vmul.f32 0.0078125, %v672_v55 }
 0x201   : > { %v692_v57 = vadd.f32 1e-05, %v683_v56 }
 0x202   : > { %v664_v58 = vpop.xlane.xlu1 %663  ;;  %v666_v59 = vpop.xlane.xlu0 %665 }
 0x203   : > { %1042 = vrsqrt.f32 %v692_v57  ;;  %v679_v60 = vmul.f32 0.0078125, %v664_v58  ;;  %v680_v61 = vmul.f32 0.0078125, %v666_v59  ;;  %v792_v57 = vld [vmem:[%s1361_s2 + $0x40] sm:$0xff] }
 0x205   : > { %v688_v62 = vadd.f32 1e-05, %v679_v60  ;;  %v689_v63 = vadd.f32 1e-05, %v680_v61 }
 0x206   : > { %v668_v3 = vpop.xlane.xlu1 %667  ;;  %v674_v4 = vpop.xlane.xlu0 %673 }
 0x207   : > { %1044 = vrsqrt.f32 %v688_v62  ;;  %v681_v5 = vmul.f32 0.0078125, %v668_v3  ;;  %v684_v6 = vmul.f32 0.0078125, %v674_v4 }
 0x208   : > { %v1037_v7 = vpop.eup %1036  ;;  %1046 = vrsqrt.f32 %v689_v63 }
 0x209   : > { %v1039_v9 = vpop.eup %1038  ;;  %v704_v10 = vmul.f32 %v1037_v7, %v1250_v15  ;;  %v690_v11 = vadd.f32 1e-05, %v681_v5  ;;  %v693_v12 = vadd.f32 1e-05, %v684_v6 }
 0x20a   : > { %v709_v2 = vmul.f32 %v1039_v9, %v1248_v14  ;;  %v676_v13 = vpop.xlane.xlu1 %675 }
 0x20b   : > { %v718_v17 = vmul.f32 %v1288_v8, %v704_v10  ;;  %1048 = vrsqrt.f32 %v690_v11  ;;  %v685_v19 = vmul.f32 0.0078125, %v676_v13 }
 0x20c   : > { %v1041_v21 = vpop.eup %1040  ;;  %v723_v15 = vmul.f32 %v1288_v8, %v709_v2  ;;  %1050 = vrsqrt.f32 %v693_v12 }
 0x20d   : > { %v775_v14 = vsel %vm748_vm4, 0.0, %v718_v17  ;;  %v705_v22 = vmul.f32 %v1041_v21, %v1256_v20  ;;  %v694_v23 = vadd.f32 1e-05, %v685_v19  ;;  %v790_v20 = vld [vmem:[%s1361_s2 + $0x30] sm:$0xff] }
 0x20e   : > { %v793_v24 = vadd.f32 %v784_v16, %v775_v14  ;;  %v798_v25 = vadd.f32 %v789_v18, %v723_v15 }
 0x20f   : > { %v719_v29 = vmul.f32 %v1288_v8, %v705_v22  ;;  %1052 = vrsqrt.f32 %v694_v23 }
 0x210   : > { %v1043_v30 = vpop.eup %1042  ;;  %802 = vst [vmem:[%s1304_s29] sm:$0xff] %v793_v24  ;;  %807 = vst [vmem:[%s1304_s29 + $0x28] sm:$0xff] %v798_v25 }
 0x211   : > { %v794_v32 = vadd.f32 %v785_v27, %v719_v29  ;;  %v710_v33 = vmul.f32 %v1043_v30, %v1260_v26 }
 0x213   : > { %803 = vst [vmem:[%s1304_s29 + $0x8] sm:$0xff] %v794_v32  ;;  %v724_v34 = vmul.f32 %v1288_v8, %v710_v33 }
 0x214   : > { %v1045_v35 = vpop.eup %1044 }
 0x215   : > { %v1047_v36 = vpop.eup %1046  ;;  %v799_v37 = vadd.f32 %v790_v20, %v724_v34  ;;  %v706_v40 = vmul.f32 %v1045_v35, %v1262_v28 }
 0x216   : > { %v707_v42 = vmul.f32 %v1047_v36, %v1266_v31  ;;  %v788_v31 = vld [vmem:[%s1361_s2 + $0x20] sm:$0xff] }
 0x217   : > { %808 = vst [vmem:[%s1304_s29 + $0x30] sm:$0xff] %v799_v37  ;;  %v720_v26 = vmul.f32 %v1288_v8, %v706_v40 }
 0x218   : > { %v1049_v45 = vpop.eup %1048  ;;  %v721_v46 = vmul.f32 %v1288_v8, %v707_v42 }
 0x219   : > { %v1051_v47 = vpop.eup %1050  ;;  %v795_v28 = vadd.f32 %v786_v41, %v720_v26  ;;  %v708_v48 = vmul.f32 %v1049_v45, %v1274_v39 }
 0x21a   : > { %v796_v49 = vadd.f32 %v787_v43, %v721_v46  ;;  %v711_v50 = vmul.f32 %v1051_v47, %v1272_v38 }
 0x21b   : > { %804 = vst [vmem:[%s1304_s29 + $0x10] sm:$0xff] %v795_v28  ;;  %v722_v51 = vmul.f32 %v1288_v8, %v708_v48 }
 0x21c   : > { %v1053_v53 = vpop.eup %1052  ;;  %805 = vst [vmem:[%s1304_s29 + $0x18] sm:$0xff] %v796_v49  ;;  %v725_v39 = vmul.f32 %v1288_v8, %v711_v50 }
 0x21d   : > { %v797_v54 = vadd.f32 %v788_v31, %v722_v51  ;;  %v712_v55 = vmul.f32 %v1053_v53, %v1280_v44 }
 0x21e   : > { %v800_v56 = vadd.f32 %v791_v52, %v725_v39 }
 0x21f   : > { %806 = vst [vmem:[%s1304_s29 + $0x20] sm:$0xff] %v797_v54  ;;  %v726_v38 = vmul.f32 %v1288_v8, %v712_v55 }
 0x220   : > { %809 = vst [vmem:[%s1304_s29 + $0x38] sm:$0xff] %v800_v56 }
 0x221   : > { %v801_v58 = vadd.f32 %v792_v57, %v726_v38 }
 0x223   : > { %810 = vst [vmem:[%s1304_s29 + $0x40] sm:$0xff] %v801_v58 }
 0x224 PF: > { %s16_s22 = sadd.s32 1, %s1076_s22   ;;  %s1365_s20 = smov %s1072_s21 }
 0x225   : > { %p13_p5 = scmp.ge.s32.totalorder %s16_s22, 4   ;;  %s1366_s21 = smov %s1368_s4 }
 0x227   :  { %15 = sbr.rel (!%p13_p5) target bundleno = 2 (0x2), region = 85 }

</bundles_post_ra>
